<compile_context>
chip_gen: v7x
topology: tpu7x:2x2x1
jax: 0.10.0
libtpu: 0.0.40
codegen_flags: <defaults>
</compile_context>

<pallas_src>
import functools

import jax
import jax.numpy as jnp
from jax.experimental import pallas as pl
from jax.experimental.pallas import tpu as pltpu


def _round_up(x, m):
    return ((x + m - 1) // m) * m


def _vmem_params():
    """Return (tile_budget_bytes, scoped_vmem_limit_bytes), generation-aware.

    v5e/v6e have 128 MiB physical VMEM -> large tiles stay on the HBM roofline
    plateau.  v7x has only 64 MiB -> keep the budget conservative so the
    double-buffered tiles + f32 temporaries never force spills.
    """
    try:
        phys = int(pltpu.get_tpu_info().vmem_capacity_bytes)
    except Exception:
        phys = 64 << 20  # assume the smallest (v7x-like) part when unknown
    if phys >= (96 << 20):          # v5e / v6e: 128 MiB physical VMEM
        return 28 << 20, 64 << 20
    return 12 << 20, 32 << 20       # v7x: 64 MiB physical VMEM


def _choose_block_rows(n_rows, d, itemsize, vmem_budget_bytes):
    """Pick the batch-tile size.

    Accounts for:
      * lane padding: a (bm, d) tile physically occupies bm x round_up(d, 128)
        lanes in VMEM,
      * 3 inputs x 2 pipeline buffers at the input itemsize,
      * 3 f32 compute temporaries from the in-kernel astype(jnp.float32).
    Also guarantees >= 2 grid steps for mid/large problems so the "parallel"
    batch axis can be sharded across both TensorCores on v7x.
    """
    d_pad = _round_up(max(d, 1), 128)
    per_row = 3 * 2 * d_pad * itemsize + 3 * d_pad * 4
    bm = int(vmem_budget_bytes // per_row)
    bm = min(bm, 2048)
    if bm >= n_rows:
        total_bytes = 3 * n_rows * d_pad * itemsize
        if n_rows >= 256 and total_bytes >= (1 << 20):
            # Big enough to be worth splitting: 2 blocks -> both v7x TCs busy.
            return _round_up(pl.cdiv(n_rows, 2), 8)
        return n_rows                      # whole batch in one (full-dim) block
    return max(8, (bm // 8) * 8)           # multiple of 8 sublanes


def _triplet_block_kernel(a_ref, p_ref, n_ref, o_ref, *, margin, n_rows,
                          block_rows):
    a = a_ref[...].astype(jnp.float32)
    p = p_ref[...].astype(jnp.float32)
    n = n_ref[...].astype(jnp.float32)

    if margin is None:
        dap = a - p
        dan = a - n
    else:
        eps = 1e-6  # matches torch.nn.functional.pairwise_distance default
        dap = a - p + eps
        dan = a - n + eps

    # per-row L2 distances, reduced over the feature axis (dim=1)
    d_ap = jnp.sqrt(jnp.sum(dap * dap, axis=1, keepdims=True))  # (bm, 1)
    d_an = jnp.sqrt(jnp.sum(dan * dan, axis=1, keepdims=True))  # (bm, 1)

    if margin is None:
        # SoftMarginLoss with y=+1 on (an - ap):  log(1 + exp(-(an - ap)))
        #   = softplus(ap - an), overflow-safe form.
        x = d_ap - d_an
        row_loss = jnp.maximum(x, 0.0) + jnp.log1p(jnp.exp(-jnp.abs(x)))
    else:
        row_loss = jnp.maximum(d_ap - d_an + margin, 0.0)

    i = pl.program_id(0)
    last = pl.num_programs(0) - 1

    # One aligned (8, 128) tile per grid step; partial sum lands in slot [0, 0].
    sub = jax.lax.broadcasted_iota(jnp.int32, (1, 8, 128), 1)
    lane = jax.lax.broadcasted_iota(jnp.int32, (1, 8, 128), 2)
    first_slot = (sub == 0) & (lane == 0)

    @pl.when(i != last)
    def _():
        # Full block: no padding mask needed.
        o_ref[...] = jnp.where(first_slot, jnp.sum(row_loss), 0.0)

    @pl.when(i == last)
    def _():
        # Trailing (possibly partial) block: mask rows beyond the true batch.
        row = i * block_rows + jax.lax.broadcasted_iota(
            jnp.int32, row_loss.shape, 0)
        masked = jnp.where(row < n_rows, row_loss, 0.0)
        o_ref[...] = jnp.where(first_slot, jnp.sum(masked), 0.0)


def triplet_loss(anchor, pos, neg, margin=None, block_rows=None):
    """Pallas implementation of TripletLoss.forward. Returns a scalar (f32).

    Feed the narrowest upstream dtype (e.g. bf16); the kernel upcasts per-tile
    in VMEM, so halving input bytes ~halves wall-clock (HBM-bound op).
    """
    assert anchor.shape == pos.shape == neg.shape and anchor.ndim == 2
    N, D = anchor.shape
    itemsize = jnp.dtype(anchor.dtype).itemsize
    tile_budget, vmem_limit = _vmem_params()

    if block_rows is None:
        block_rows = _choose_block_rows(N, D, itemsize, tile_budget)
    block_rows = max(1, min(int(block_rows), N))
    if block_rows < N:
        block_rows = max(8, (block_rows // 8) * 8)   # keep sublane alignment
    num_blocks = pl.cdiv(N, block_rows)
    grid = (num_blocks,)

    kernel = functools.partial(
        _triplet_block_kernel,
        margin=None if margin is None else float(margin),
        n_rows=N, block_rows=block_rows)

    cost = pl.CostEstimate(
        flops=6 * N * D + 10 * N,
        transcendentals=(4 if margin is None else 2) * N,
        bytes_accessed=3 * N * D * itemsize + num_blocks * 8 * 128 * 4,
    )

    block_bytes = block_rows * D * itemsize

    def _call(use_buffered):
        if use_buffered:
            in_spec = pl.BlockSpec((block_rows, D), lambda i: (i, 0),
                                   pipeline_mode=pl.Buffered(3))
        else:
            in_spec = pl.BlockSpec((block_rows, D), lambda i: (i, 0))
        out_spec = pl.BlockSpec((1, 8, 128), lambda i: (i, 0, 0))
        return pl.pallas_call(
            kernel,
            out_shape=jax.ShapeDtypeStruct((num_blocks, 8, 128), jnp.float32),
            grid=grid,
            in_specs=[in_spec, in_spec, in_spec],
            out_specs=out_spec,
            compiler_params=pltpu.CompilerParams(
                dimension_semantics=("parallel",),   # batch axis: megacore-splittable
                vmem_limit_bytes=vmem_limit,
            ),
            cost_estimate=cost,
        )(anchor, pos, neg)

    # Deeper pipelining only pays off for tiny tiles; fall back to the plain
    # double-buffered spec if Buffered pipeline_mode is unavailable.
    want_buffered = (num_blocks >= 3) and (block_bytes <= (512 << 10))
    if want_buffered:
        try:
            partial_sums = _call(True)
        except Exception:
            partial_sums = _call(False)
    else:
        partial_sums = _call(False)

    # Tiny final reduction over num_blocks aligned tiles (padded slots are 0);
    # divisor is the true N, so the mean is exact.
    return jnp.sum(partial_sums) / N


if __name__ == "__main__":
    key = jax.random.PRNGKey(0)
    k1, k2, k3 = jax.random.split(key, 3)

    def _refs(anchor, pos, neg, margin):
        ap = jnp.linalg.norm(anchor - pos, axis=1)
        an = jnp.linalg.norm(anchor - neg, axis=1)
        ref_soft = jnp.mean(jax.nn.softplus(-(an - ap)))
        eps = 1e-6
        d_ap = jnp.sqrt(jnp.sum((anchor - pos + eps) ** 2, axis=1))
        d_an = jnp.sqrt(jnp.sum((anchor - neg + eps) ** 2, axis=1))
        ref_margin = jnp.mean(jnp.maximum(d_ap - d_an + margin, 0.0))
        return ref_soft, ref_margin

    # --- test 1: small batch, single block (N=8, D=32) -----------------------
    N, D = 8, 32
    anchor = jax.random.normal(k1, (N, D), dtype=jnp.float32)
    pos = jax.random.normal(k2, (N, D), dtype=jnp.float32)
    neg = jax.random.normal(k3, (N, D), dtype=jnp.float32)

    loss_soft = triplet_loss(anchor, pos, neg, margin=None)
    loss_margin = triplet_loss(anchor, pos, neg, margin=0.3)
    jax.block_until_ready((loss_soft, loss_margin))

    ref_soft, ref_margin = _refs(anchor, pos, neg, 0.3)
    assert jnp.allclose(loss_soft, ref_soft, atol=1e-5, rtol=1e-5)
    assert jnp.allclose(loss_margin, ref_margin, atol=1e-5, rtol=1e-5)

    # --- test 2: batch not a multiple of the tile (masking + small-tile path) -
    N2, D2 = 20, 32
    ka, kp, kn = jax.random.split(jax.random.PRNGKey(1), 3)
    a2 = jax.random.normal(ka, (N2, D2), dtype=jnp.float32)
    p2 = jax.random.normal(kp, (N2, D2), dtype=jnp.float32)
    n2 = jax.random.normal(kn, (N2, D2), dtype=jnp.float32)

    loss_soft2 = triplet_loss(a2, p2, n2, margin=None, block_rows=8)   # grid=(3,)
    loss_margin2 = triplet_loss(a2, p2, n2, margin=0.3, block_rows=8)
    jax.block_until_ready((loss_soft2, loss_margin2))

    ref_soft2, ref_margin2 = _refs(a2, p2, n2, 0.3)
    assert jnp.allclose(loss_soft2, ref_soft2, atol=1e-5, rtol=1e-5)
    assert jnp.allclose(loss_margin2, ref_margin2, atol=1e-5, rtol=1e-5)

    # --- test 3: larger batch, exercises the auto >=2-block split ------------
    N3, D3 = 512, 256
    kb, kq, kr = jax.random.split(jax.random.PRNGKey(2), 3)
    a3 = jax.random.normal(kb, (N3, D3), dtype=jnp.float32)
    p3 = jax.random.normal(kq, (N3, D3), dtype=jnp.float32)
    n3 = jax.random.normal(kr, (N3, D3), dtype=jnp.float32)

    loss_soft3 = triplet_loss(a3, p3, n3, margin=None)    # default tiling, grid=(2,)
    loss_margin3 = triplet_loss(a3, p3, n3, margin=0.3)
    jax.block_until_ready((loss_soft3, loss_margin3))

    ref_soft3, ref_margin3 = _refs(a3, p3, n3, 0.3)
    assert jnp.allclose(loss_soft3, ref_soft3, atol=1e-5, rtol=1e-5)
    assert jnp.allclose(loss_margin3, ref_margin3, atol=1e-5, rtol=1e-5)

    print("KERNEL_OK")
</pallas_src>

<mosaic_0001>
module attributes {stable_mosaic.version = 11 : i64} {
  func.func @_triplet_block_kernel(%arg0: i32, %arg1: memref<8x32xf32, #tpu.memory_space<vmem>>, %arg2: memref<8x32xf32, #tpu.memory_space<vmem>>, %arg3: memref<8x32xf32, #tpu.memory_space<vmem>>, %arg4: memref<1x8x128xf32, #tpu.memory_space<vmem>>) attributes {dimension_semantics = [#tpu.dimension_semantics<parallel>], iteration_bounds = array<i64: 1>, scalar_prefetch = 0 : i64, scratch_operands = 0 : i64, tpu.core_type = #tpu.core_type<tc>, window_params = [{transform_indices = @transform_0, window_bounds = array<i64: 8, 32>}, {transform_indices = @transform_1, window_bounds = array<i64: 8, 32>}, {transform_indices = @transform_2, window_bounds = array<i64: 8, 32>}, {transform_indices = @transform_3, window_bounds = array<i64: 1, 8, 128>}]} {
    %c0 = arith.constant 0 : index
    %c0_0 = arith.constant 0 : index
    %0 = vector.load %arg1[%c0, %c0_0] : memref<8x32xf32, #tpu.memory_space<vmem>>, vector<8x32xf32>
    %c0_1 = arith.constant 0 : index
    %c0_2 = arith.constant 0 : index
    %1 = vector.load %arg2[%c0_1, %c0_2] : memref<8x32xf32, #tpu.memory_space<vmem>>, vector<8x32xf32>
    %c0_3 = arith.constant 0 : index
    %c0_4 = arith.constant 0 : index
    %2 = vector.load %arg3[%c0_3, %c0_4] : memref<8x32xf32, #tpu.memory_space<vmem>>, vector<8x32xf32>
    %3 = arith.subf %0, %1 : vector<8x32xf32>
    %4 = arith.subf %0, %2 : vector<8x32xf32>
    %5 = arith.mulf %3, %3 : vector<8x32xf32>
    %cst = arith.constant dense<0.000000e+00> : vector<8xf32>
    %6 = vector.multi_reduction <add>, %5, %cst [1] : vector<8x32xf32> to vector<8xf32>
    %7 = vector.shape_cast %6 : vector<8xf32> to vector<8x1xf32>
    %8 = math.sqrt %7 : vector<8x1xf32>
    %9 = arith.mulf %4, %4 : vector<8x32xf32>
    %cst_5 = arith.constant dense<0.000000e+00> : vector<8xf32>
    %10 = vector.multi_reduction <add>, %9, %cst_5 [1] : vector<8x32xf32> to vector<8xf32>
    %11 = vector.shape_cast %10 : vector<8xf32> to vector<8x1xf32>
    %12 = math.sqrt %11 : vector<8x1xf32>
    %13 = arith.subf %8, %12 : vector<8x1xf32>
    %cst_6 = arith.constant 0.000000e+00 : f32
    %14 = vector.broadcast %cst_6 : f32 to vector<8x1xf32>
    %15 = arith.maximumf %13, %14 : vector<8x1xf32>
    %16 = math.absf %13 : vector<8x1xf32>
    %cst_7 = arith.constant 0.000000e+00 : f32
    %17 = vector.broadcast %cst_7 : f32 to vector<8x1xf32>
    %18 = arith.subf %17, %16 : vector<8x1xf32>
    %19 = math.exp %18 : vector<8x1xf32>
    %20 = math.log1p %19 : vector<8x1xf32>
    %21 = arith.addf %15, %20 : vector<8x1xf32>
    %22 = tpu.iota {dimensions = array<i32: 1>} : vector<1x8x128xi32>
    %23 = tpu.iota {dimensions = array<i32: 2>} : vector<1x8x128xi32>
    %c0_i32 = arith.constant 0 : i32
    %24 = vector.broadcast %c0_i32 : i32 to vector<1x8x128xi32>
    %25 = arith.cmpi eq, %22, %24 : vector<1x8x128xi32>
    %c0_i32_8 = arith.constant 0 : i32
    %26 = vector.broadcast %c0_i32_8 : i32 to vector<1x8x128xi32>
    %27 = arith.cmpi eq, %23, %26 : vector<1x8x128xi32>
    %28 = arith.andi %25, %27 : vector<1x8x128xi1>
    %c0_i32_9 = arith.constant 0 : i32
    %29 = arith.cmpi ne, %arg0, %c0_i32_9 : i32
    %30 = arith.extui %29 : i1 to i32
    %c0_i32_10 = arith.constant 0 : i32
    %31 = arith.cmpi ne, %30, %c0_i32_10 : i32
    scf.if %31 {
      %35 = vector.shape_cast %21 : vector<8x1xf32> to vector<1x8x1xf32>
      %cst_13 = arith.constant dense<0.000000e+00> : vector<1xf32>
      %36 = vector.multi_reduction <add>, %35, %cst_13 [1, 2] : vector<1x8x1xf32> to vector<1xf32>
      %37 = vector.shape_cast %36 : vector<1xf32> to vector<1x1x1xf32>
      %38 = vector.extract %37[0, 0, 0] : f32 from vector<1x1x1xf32>
      %cst_14 = arith.constant 0.000000e+00 : f32
      %39 = vector.broadcast %38 : f32 to vector<1x8x128xf32>
      %40 = vector.broadcast %cst_14 : f32 to vector<1x8x128xf32>
      %41 = arith.select %28, %39, %40 : vector<1x8x128xi1>, vector<1x8x128xf32>
      %c0_15 = arith.constant 0 : index
      %c0_16 = arith.constant 0 : index
      %c0_17 = arith.constant 0 : index
      %42 = vector.load %arg4[%c0_15, %c0_16, %c0_17] : memref<1x8x128xf32, #tpu.memory_space<vmem>>, vector<1x8x128xf32>
      tpu.vector_store %arg4[%c0_15, %c0_16, %c0_17], %41 {strides = array<i32>} : memref<1x8x128xf32, #tpu.memory_space<vmem>>, vector<1x8x128xf32>,
    } else {
    }
    %c0_i32_11 = arith.constant 0 : i32
    %32 = arith.cmpi eq, %arg0, %c0_i32_11 : i32
    %33 = arith.extui %32 : i1 to i32
    %c0_i32_12 = arith.constant 0 : i32
    %34 = arith.cmpi ne, %33, %c0_i32_12 : i32
    scf.if %34 {
      %c8_i32 = arith.constant 8 : i32
      %35 = arith.muli %arg0, %c8_i32 : i32
      %36 = tpu.iota {dimensions = array<i32: 0>} : vector<8x1xi32>
      %37 = vector.broadcast %35 : i32 to vector<8x1xi32>
      %38 = arith.addi %37, %36 : vector<8x1xi32>
      %c8_i32_13 = arith.constant 8 : i32
      %39 = vector.broadcast %c8_i32_13 : i32 to vector<8x1xi32>
      %40 = arith.cmpi slt, %38, %39 : vector<8x1xi32>
      %cst_14 = arith.constant 0.000000e+00 : f32
      %41 = vector.broadcast %cst_14 : f32 to vector<8x1xf32>
      %42 = arith.select %40, %21, %41 : vector<8x1xi1>, vector<8x1xf32>
      %43 = vector.shape_cast %42 : vector<8x1xf32> to vector<1x8x1xf32>
      %cst_15 = arith.constant dense<0.000000e+00> : vector<1xf32>
      %44 = vector.multi_reduction <add>, %43, %cst_15 [1, 2] : vector<1x8x1xf32> to vector<1xf32>
      %45 = vector.shape_cast %44 : vector<1xf32> to vector<1x1x1xf32>
      %46 = vector.extract %45[0, 0, 0] : f32 from vector<1x1x1xf32>
      %cst_16 = arith.constant 0.000000e+00 : f32
      %47 = vector.broadcast %46 : f32 to vector<1x8x128xf32>
      %48 = vector.broadcast %cst_16 : f32 to vector<1x8x128xf32>
      %49 = arith.select %28, %47, %48 : vector<1x8x128xi1>, vector<1x8x128xf32>
      %c0_17 = arith.constant 0 : index
      %c0_18 = arith.constant 0 : index
      %c0_19 = arith.constant 0 : index
      %50 = vector.load %arg4[%c0_17, %c0_18, %c0_19] : memref<1x8x128xf32, #tpu.memory_space<vmem>>, vector<1x8x128xf32>
      tpu.vector_store %arg4[%c0_17, %c0_18, %c0_19], %49 {strides = array<i32>} : memref<1x8x128xf32, #tpu.memory_space<vmem>>, vector<1x8x128xf32>,
    } else {
    }
    return
  }
  func.func @transform_0(%arg0: i32) -> (i32, i32) {
    %c0_i32 = arith.constant 0 : i32
    %c0_i32_0 = arith.constant 0 : i32
    return %arg0, %c0_i32 : i32, i32
  }
  func.func @transform_1(%arg0: i32) -> (i32, i32) {
    %c0_i32 = arith.constant 0 : i32
    %c0_i32_0 = arith.constant 0 : i32
    return %arg0, %c0_i32 : i32, i32
  }
  func.func @transform_2(%arg0: i32) -> (i32, i32) {
    %c0_i32 = arith.constant 0 : i32
    %c0_i32_0 = arith.constant 0 : i32
    return %arg0, %c0_i32 : i32, i32
  }
  func.func @transform_3(%arg0: i32) -> (i32, i32, i32) {
    %c0_i32 = arith.constant 0 : i32
    %c0_i32_0 = arith.constant 0 : i32
    %c0_i32_1 = arith.constant 0 : i32
    return %arg0, %c0_i32, %c0_i32_0 : i32, i32, i32
  }
}

</mosaic_0001>

<bundles_post_ra>
// kernel: tpu_custom_call.1
= control target key start
LH: loop header
LB: loop body
LE: loop exit
PB: predicated region body
PF: predicated region fallthrough
CT: control target
= control target key end

     0   :  { %8 = vsyncpa [#allocation3], 0  ;;  %s338_s0 = inlined_call_operand.hbm [shape: f32[8,32], index: 0, kind: input, shape index: {}]   ;;  %s339_s1 = inlined_call_operand.hbm [shape: f32[8,32], index: 1, kind: input, shape index: {}]   ;;  %s340_s2 = inlined_call_operand.hbm [shape: f32[8,32], index: 2, kind: input, shape index: {}]   ;;  %s341_s3 = inlined_call_operand.hbm [shape: f32[1,8,128], index: 3, kind: output, shape index: {}]  }
   0x1   :  { %9 = vsyncpa [#allocation6], 0 }
   0x2   :  { %10 = vsyncpa [#allocation4], 0  ;;  %s266_s12 = smov [#allocation5]   ;;  %s267_s14 = smov [#allocation2]  }
   0x3   :  { %s27_s13 = sshll.u32 %s266_s12, 4  ;;  %s17_s15 = sshll.u32 %s267_s14, 4  ;;  %s28_s13 = int_to_ptr.vmem [resolvable:$true] %s27_s13  ;;  %s18_s15 = int_to_ptr.vmem [resolvable:$true] %s17_s15 }
   0x4   :  { %s172_s18 = scalar_lea.hbm %s339_s1, 128 }
   0x5   :  { %p173_p0 = scmp.ne.s32.totalorder %s339_s1, %s172_s18  ;;  %p176_p1 = scmp.lt.u32.totalorder %s172_s18, %s339_s1 }
   0x7   :  { %p178_p2 = pnand %p176_p1, %p173_p0 }
   0x9   :  { %181 = shalt.err (!%p178_p2)
}
   0xa   :  { %s182_s23 = scalar_lea.vmem %s28_s13, 128  ;;  %p187_p4 = scmp.lt.s32.totalorder %s28_s13, %s28_s13 }
   0xb   :  { %p183_p3 = scmp.ne.s32.totalorder %s28_s13, %s182_s23  ;;  %p188_p5 = scmp.lt.s32.totalorder %s182_s23, %s182_s23 }
   0xd   :  { %p189_p6 = por %p188_p5, %p187_p4 }
   0xf   :  { %p190_p7 = pnand %p189_p6, %p183_p3 }
  0x11   :  { %193 = shalt.err (!%p190_p7)
}
  0x12   :  { %30 = dma.hbm_to_vmem [thread:$0]  %s339_s1, 128, %s28_s13, [#allocation6]  }
  0x13   :  { %s194_s28 = scalar_lea.hbm %s338_s0, 128 }
  0x14   :  { %p195_p8 = scmp.ne.s32.totalorder %s338_s0, %s194_s28  ;;  %p198_p9 = scmp.lt.u32.totalorder %s194_s28, %s338_s0 }
  0x16   :  { %p200_p10 = pnand %p198_p9, %p195_p8 }
  0x18   :  { %203 = shalt.err (!%p200_p10)
}
  0x19   :  { %s204_s6 = scalar_lea.vmem %s18_s15, 128  ;;  %p209_p12 = scmp.lt.s32.totalorder %s18_s15, %s18_s15 }
  0x1a   :  { %p205_p11 = scmp.ne.s32.totalorder %s18_s15, %s204_s6  ;;  %p210_p13 = scmp.lt.s32.totalorder %s204_s6, %s204_s6 }
  0x1c   :  { %p211_p0 = por %p210_p13, %p209_p12 }
  0x1e   :  { %p212_p1 = pnand %p211_p0, %p205_p11 }
  0x20   :  { %215 = shalt.err (!%p212_p1)
}
  0x21   :  { %20 = dma.hbm_to_vmem [thread:$0]  %s338_s0, 128, %s18_s15, [#allocation3]  }
  0x22   :  { %s268_s8 = smov [#allocation7]   ;;  %s216_s12 = scalar_lea.hbm %s340_s2, 128 }
  0x23   :  { %s37_s9 = sshll.u32 %s268_s8, 4  ;;  %p217_p2 = scmp.ne.s32.totalorder %s340_s2, %s216_s12  ;;  %s38_s9 = int_to_ptr.vmem [resolvable:$true] %s37_s9 }
  0x24   :  { %p220_p3 = scmp.lt.u32.totalorder %s216_s12, %s340_s2 }
  0x26   :  { %p222_p4 = pnand %p220_p3, %p217_p2 }
  0x28   :  { %225 = shalt.err (!%p222_p4)
}
  0x29   :  { %s226_s18 = scalar_lea.vmem %s38_s9, 128  ;;  %p231_p6 = scmp.lt.s32.totalorder %s38_s9, %s38_s9 }
  0x2a   :  { %p227_p5 = scmp.ne.s32.totalorder %s38_s9, %s226_s18  ;;  %p232_p7 = scmp.lt.s32.totalorder %s226_s18, %s226_s18 }
  0x2c   :  { %p233_p8 = por %p232_p7, %p231_p6 }
  0x2e   :  { %p234_p9 = pnand %p233_p8, %p227_p5 }
  0x30   :  { %237 = shalt.err (!%p234_p9)
}
  0x31   :  { %40 = dma.hbm_to_vmem [thread:$0]  %s340_s2, 128, %s38_s9, [#allocation6]  }
  0x32   :  { %260 = dma.done.wait [#allocation3], 128  }
  0x33   :  { %261 = vsyncadd [#allocation3], 4294967168 }
  0x34   :  { %262 = dma.done.wait [#allocation6], 256  }
  0x35   :  { %263 = vsyncadd [#allocation6], 4294967040  ;;  %v50_v0 = vld [vmem:[#allocation2] sm:$0xff]  ;;  %v51_v1 = vld [vmem:[#allocation5] sm:$0xff]  ;;  %vm56_vm0 = vcmask 261120   ;;  %vm128_vm6 = vcmask 7168   ;;  %v94_v44 = vlaneseq }
  0x36   :  { %v52_v2 = vld [vmem:[#allocation7] sm:$0xff]  ;;  %v53_v3 = vsub.f32 %v50_v0, %v51_v1  ;;  %s269_s2 = smov [#allocation8]  }
  0x37   :  { %v54_v4 = vsub.f32 %v50_v0, %v52_v2  ;;  %v95_v45 = vshrl.u32 %v94_v44, 7  ;;  %v97_v46 = vand.u32 127, %v94_v44  ;;  %s148_s19 = sshll.u32 %s269_s2, 4  ;;  %s149_s19 = int_to_ptr.vmem [resolvable:$true] %s148_s19 }
  0x38   :  { %v55_v5 = vmul.f32 %v53_v3, %v53_v3  ;;  %s238_s21 = scalar_lea.vmem %s149_s19, 128  ;;  %p243_p11 = scmp.lt.s32.totalorder %s149_s19, %s149_s19 }
  0x39   :  { %v67_v6 = vmul.f32 %v54_v4, %v54_v4  ;;  %vm98_vm7 = vcmp.eq.s32.totalorder %v95_v45, 0  ;;  %vm99_vm8 = vcmp.eq.s32.totalorder %v97_v46, 0  ;;  %p239_p10 = scmp.ne.s32.totalorder %s149_s19, %s238_s21  ;;  %p244_p12 = scmp.lt.s32.totalorder %s238_s21, %s238_s21 }
  0x3a   :  { %v57_v7 = vsel %vm56_vm0, %v55_v5, 0.0  ;;  %vm100_vm9 = vmand %vm98_vm7, %vm99_vm8 }
  0x3b   :  { %58 = vadd.xlane.f32.xlu0 %v57_v7  ;;  %v68_v8 = vsel %vm56_vm0, %v67_v6, 0.0  ;;  %p245_p13 = por %p244_p12, %p243_p11 }
  0x3d   :  { %p246_p0 = pnand %p245_p13, %p239_p10 }
  0x3f   :  { %69 = vadd.xlane.f32.xlu0 %v68_v8 }
  0xc8   :  { %v59_v9 = vpop.xlane.xlu0 %58 }
  0xc9   :  { %164 = vrsqrt.f32 %v59_v9  ;;  %vm62_vm1 = vcmp.eq.f32.partialorder %v59_v9, inf  ;;  %v65_v17 = vand.u32 2147483648, %v59_v9  ;;  %vm64_vm4 = vcmp.eq.f32.partialorder %v59_v9, 0.0 }
  0xcc   :  { %v70_v10 = vpop.xlane.xlu0 %69 }
  0xcd   :  { %166 = vrsqrt.f32 %v70_v10  ;;  %vm73_vm2 = vcmp.eq.f32.partialorder %v70_v10, inf  ;;  %v76_v16 = vand.u32 2147483648, %v70_v10  ;;  %vm75_vm3 = vcmp.eq.f32.partialorder %v70_v10, 0.0 }
  0xd3   :  { %v165_v11 = vpop.eup %164 }
  0xd4   :  { %v61_v12 = vmul.f32 %v165_v11, %v59_v9 }
  0xd6   :  { %v63_v15 = vsel %vm62_vm1, %v59_v9, %v61_v12 }
  0xd7   :  { %v167_v13 = vpop.eup %166  ;;  %v66_v19 = vsel %vm64_vm4, %v65_v17, %v63_v15 }
  0xd8   :  { %v72_v14 = vmul.f32 %v167_v13, %v70_v10 }
  0xda   :  { %v74_v18 = vsel %vm73_vm2, %v70_v10, %v72_v14 }
  0xdb   :  { %v77_v20 = vsel %vm75_vm3, %v76_v16, %v74_v18 }
  0xdc   :  { %v78_v21 = vsub.f32 %v66_v19, %v77_v20 }
  0xde   :  { %v80_v22 = vand.u32 2147483647, %v78_v21  ;;  %v79_v33 = vmax.f32 %v78_v21, 0.0 }
  0xe0   :  { %v81_v23 = vsub.f32 0.0, %v80_v22 }
  0xe2   :  { %v82_v24 = vmul.f32 1.442695, %v81_v23 }
  0xe4   :  { %168 = vpow2.f32 %v82_v24 }
  0xee   :  { %v169_v25 = vpop.eup %168 }
  0xef   :  { %v84_v26 = vadd.f32 1.0, %v169_v25  ;;  %v87_v27 = vmul.f32 -0.5, %v169_v25  ;;  %v90_v29 = vand.u32 2147483647, %v169_v25 }
  0xf1   :  { %170 = vlog2.f32 %v84_v26  ;;  %v88_v28 = vadd.f32 1.0, %v87_v27  ;;  %vm91_vm5 = vcmp.lt.f32.partialorder %v90_v29, 0.0004427343 }
  0xf3   :  { %v89_v32 = vmul.f32 %v169_v25, %v88_v28 }
  0xfb   :  { %v171_v30 = vpop.eup %170 }
  0xfc   :  { %v86_v31 = vmul.f32 0.6931472, %v171_v30 }
  0xfe   :  { %v92_v34 = vsel %vm91_vm5, %v89_v32, %v86_v31 }
  0xff   :  { %v93_v35 = vadd.f32 %v92_v34, %v79_v33 }
 0x101   :  { %v129_v36 = vsel %vm128_vm6, %v93_v35, 0.0 }
 0x102   :  { %130 = vadd.xlane.f32.xlu1 %v129_v36 }
 0x18f   :  { %v131_v37 = vpop.xlane.xlu1 %130 }
 0x190   :  { %v132_v38 = vrot.slane %v131_v37, 4 }
 0x192   :  { %v133_v39 = vadd.f32 %v132_v38, %v131_v37 }
 0x194   :  { %v134_v40 = vrot.slane %v133_v39, 2 }
 0x196   :  { %v135_v41 = vadd.f32 %v134_v40, %v133_v39 }
 0x198   :  { %v136_v42 = vrot.slane %v135_v41, 1 }
 0x19a   :  { %v137_v43 = vadd.f32 %v136_v42, %v135_v41 }
 0x19c   :  { %158 = vpush %v137_v43 }
 0x1cd   :  { %s159_s20 = spop %158 }
 0x1ce   :  { %v139_v47 = vstv %s159_s20 }
 0x1cf   :  { %v140_v48 = vsel %vm100_vm9, %v139_v47, 0.0 }
 0x1d0   :  { %141 = vst [vmem:[#allocation8] sm:$0xff] %v140_v48 }
 0x1d1   :  { %249 = shalt.err (!%p246_p0)
}
 0x1d2   :  { %s250_s24 = scalar_lea.hbm %s341_s3, 128 }
 0x1d3   :  { %p251_p1 = scmp.ne.s32.totalorder %s341_s3, %s250_s24  ;;  %p254_p2 = scmp.lt.u32.totalorder %s250_s24, %s341_s3 }
 0x1d5   :  { %p256_p3 = pnand %p254_p2, %p251_p1 }
 0x1d7   :  { %259 = shalt.err (!%p256_p3)
}
 0x1d8   :  { %151 = dma.vmem_to_hbm [thread:$0]  %s149_s19, 128, %s341_s3, [#allocation4]  }
 0x1d9   :  { %264 = dma.done.wait [#allocation4], 128  }
 0x1da   :  { %265 = vsyncadd [#allocation4], 4294967168 }
 0x1db   :  { %155 = vsyncpa [#allocation3], 1 }
 0x1dc   :  { %156 = vsyncpa [#allocation6], 1 }
 0x1dd   :  { %157 = vsyncpa [#allocation4], 1 }

</bundles_post_ra>
